<compile_context>
chip_gen: v5e
topology: v5e:2x2
jax: 0.10.0
libtpu: 0.0.40
codegen_flags: <defaults>
</compile_context>

<pallas_src>
import functools

import numpy as np
import jax
import jax.numpy as jnp
from jax.experimental import pallas as pl
from jax.experimental.pallas import tpu as pltpu


# -----------------------------------------------------------------------------
# Fixed wavelet constructor (used only by the pure-JAX reference; the kernel
# bakes its sparsity in as diffusion-level differences).
# -----------------------------------------------------------------------------
WAVELET_CONSTRUCTOR = jnp.array(
    [[0, -1.0, 1, 0, 0, 0, 0, 0, 0, 0, 0, 0, 0, 0, 0, 0, 0],
     [0, 0, -1, 0, 1, 0, 0, 0, 0, 0, 0, 0, 0, 0, 0, 0, 0],
     [0, 0, 0, 0, -1, 0, 0, 0, 1, 0, 0, 0, 0, 0, 0, 0, 0],
     [0, 0, 0, 0, 0, 0, 0, 0, -1, 0, 0, 0, 0, 0, 0, 0, 1]],
    dtype=jnp.float32)                                           # [4, 17]


def feng_filters():
    results = [4]
    for i in range(2, 4):
        for j in range(0, i):
            results.append(4 * i + j)
    return results                                               # [4, 8, 9, 12, 13, 14]


# -----------------------------------------------------------------------------
# Graph preprocessing glue (gcn_norm + scatter -> dense lazy-walk matrices)
# -----------------------------------------------------------------------------
def build_propagation_matrix(edge_index, edge_weight, num_nodes):
    """M such that `propagate(x) == M @ x` (aggr='add', gcn_norm with pow(-1))."""
    row, col = edge_index[0], edge_index[1]
    if edge_weight is None:
        edge_weight = jnp.ones((edge_index.shape[1],), dtype=jnp.float32)
    deg = jnp.zeros((num_nodes,), jnp.float32).at[col].add(edge_weight)
    deg_inv = jnp.where(deg == 0.0, 0.0, 1.0 / deg)              # inf -> 0
    norm = deg_inv[row] * edge_weight
    M = jnp.zeros((num_nodes, num_nodes), jnp.float32).at[col, row].add(norm)
    return M


def build_lazy_walk_matrix_T(edge_index, edge_weight, num_nodes):
    """A^T with A = 0.5*(I + M); one lazy-diffusion step in the node-on-lanes
    layout is `lvl @ A^T` for lvl: (F, N).  Built without jnp.eye / extra
    N^2 temporaries (scatter of 0.5*norm + diagonal add)."""
    row, col = edge_index[0], edge_index[1]
    if edge_weight is None:
        edge_weight = jnp.ones((edge_index.shape[1],), dtype=jnp.float32)
    deg = jnp.zeros((num_nodes,), jnp.float32).at[col].add(edge_weight)
    deg_inv = jnp.where(deg == 0.0, 0.0, 1.0 / deg)
    norm = deg_inv[row] * edge_weight
    diag = jnp.arange(num_nodes)
    a_t = jnp.zeros((num_nodes, num_nodes), jnp.float32).at[row, col].add(0.5 * norm)
    a_t = a_t.at[diag, diag].add(0.5)
    return a_t                                                   # (N, N)


def build_diffusion_powers_T(edge_index, edge_weight, num_nodes):
    """Stacked [(A^T)^1, (A^T)^2, (A^T)^4, (A^T)^8] — computed once per graph
    (cache across forward calls when edge_index is static)."""
    p1 = build_lazy_walk_matrix_T(edge_index, edge_weight, num_nodes)
    p2 = jnp.dot(p1, p1, preferred_element_type=jnp.float32)
    p4 = jnp.dot(p2, p2, preferred_element_type=jnp.float32)
    p8 = jnp.dot(p4, p4, preferred_element_type=jnp.float32)
    return jnp.stack([p1, p2, p4, p8])                           # (4, N, N)


# -----------------------------------------------------------------------------
# Fused Pallas kernel: both wavelet stages (5 matmuls each) + |.|
# -----------------------------------------------------------------------------
def _legs_fused_kernel(ap_ref, x_ref, out1_ref, out2_ref):
    """ap_ref  : VMEM (4, N, N)   stacked (A^T)^{1,2,4,8}, resident once
       x_ref   : VMEM (C, N)      input features, nodes on the lane axis
       out1_ref: VMEM (4*C, N)    |stage-1 bands|, row = k1*C + c
       out2_ref: VMEM (16*C, N)   |stage-2 bands|, row = k2*(4*C) + k1*C + c
    """
    def bands(lvl0):
        # band_k = lvl_{2^(k+1)} - lvl_{2^k};  lvl_{2^(k+1)} = lvl_{2^k} @ P_{2^k}
        prev = jnp.dot(lvl0, ap_ref[0], preferred_element_type=jnp.float32)  # lvl_1
        outs = []
        for k in range(4):                                       # P_1, P_2, P_4, P_8
            cur = jnp.dot(prev, ap_ref[k], preferred_element_type=jnp.float32)
            outs.append(jnp.abs(cur - prev))
            prev = cur
        # Single full-array, lane-dense, unmasked store per stage.
        return jnp.concatenate(outs, axis=0)

    s1 = bands(x_ref[...].astype(jnp.float32))                   # (4*C, N)
    out1_ref[...] = s1
    # Stage 2 consumes the stage-1 bands straight from registers (A-powers
    # still resident, no HBM round-trip, no out1 read-back).
    out2_ref[...] = bands(s1)                                    # (16*C, N)


def _vmem_limit_bytes(n, c):
    itm = 4                                                       # f32
    a_pow = 4 * n * n * itm                                       # resident powers
    io = (c + 4 * c + 16 * c) * n * itm                           # x + out1 + out2
    live = 8 * (4 * c) * n * itm                                  # band intermediates
    total = int(1.25 * (a_pow + io + live)) + (4 << 20)
    return max(16 << 20, min(total, 128 << 20))


def legs_fused(a_powers_t, x_t):
    """a_powers_t: (4, N, N) stacked (A^T)^{1,2,4,8},  x_t: (C, N).
    Returns (out1, out2): (4*C, N) stage-1 bands, (16*C, N) stage-2 bands (abs)."""
    C, N = x_t.shape
    flops = 2 * 5 * (C + 4 * C) * N * N                           # 10 matmuls
    bytes_accessed = (4 * N * N + (c := C) * N + 4 * c * N + 16 * c * N) * 4
    return pl.pallas_call(
        _legs_fused_kernel,
        out_shape=(jax.ShapeDtypeStruct((4 * C, N), jnp.float32),
                   jax.ShapeDtypeStruct((16 * C, N), jnp.float32)),
        in_specs=[
            pl.BlockSpec(memory_space=pltpu.MemorySpace.VMEM),    # A^T powers
            pl.BlockSpec(memory_space=pltpu.MemorySpace.VMEM),    # x^T (C, N)
        ],
        out_specs=(pl.BlockSpec(memory_space=pltpu.MemorySpace.VMEM),
                   pl.BlockSpec(memory_space=pltpu.MemorySpace.VMEM)),
        compiler_params=pltpu.CompilerParams(
            vmem_limit_bytes=_vmem_limit_bytes(N, C)),
        cost_estimate=pl.CostEstimate(flops=flops, transcendentals=0,
                                      bytes_accessed=bytes_accessed),
    )(a_powers_t, x_t)


# -----------------------------------------------------------------------------
# LegsFilter forward (wrapper reshapes mirror the PyTorch module exactly)
# -----------------------------------------------------------------------------
@jax.jit
def legs_filter_forward(x, edge_index, edge_attr=None):
    N, C = x.shape
    a_powers_t = build_diffusion_powers_T(edge_index, edge_attr, N)
    out1, out2 = legs_fused(a_powers_t, jnp.transpose(x).astype(jnp.float32))

    s0 = x[:, :, None]                                           # [N, C, 1]
    s1 = jnp.transpose(out1.reshape(4, C, N), (2, 1, 0))         # [N, C, 4]
    sub2 = out2.reshape(4, 4, C, N)                              # [k2, k1, c, n]
    s2_full = jnp.transpose(sub2, (3, 0, 1, 2)).reshape(N, 16, C)
    s2 = s2_full[:, jnp.array(feng_filters())]                   # [N, 6, C]
    xcat = jnp.concatenate([s0, s1], axis=2)                     # [N, C, 5]
    xcat = jnp.transpose(xcat, (0, 2, 1))                        # [N, 5, C]
    xcat = jnp.concatenate([xcat, s2], axis=1)                   # [N, 11, C]
    return xcat.reshape(N, -1)                                   # [N, 11*C]


# -----------------------------------------------------------------------------
# Pure-JAX reference (mirrors the PyTorch module: dense W, 0.5*(x + Mx))
# -----------------------------------------------------------------------------
def _assemble_ref(x, s0, s1_bands, s2_bands, C):
    N = x.shape[0]
    s1 = jnp.transpose(s1_bands, (1, 2, 0))                      # [N, C, 4]
    sub2 = s2_bands.reshape(4, N, C, 4)                          # [4, N, C, 4]
    sub2 = jnp.transpose(sub2, (1, 0, 2, 3)).reshape(N * 4, C, 4)
    s2_swapped = jnp.transpose(sub2, (0, 2, 1)).reshape(N, 16, C)
    s2 = s2_swapped[:, jnp.array(feng_filters())]                # [N, 6, C]
    xcat = jnp.concatenate([s0, s1], axis=2)                     # [N, C, 5]
    xcat = jnp.transpose(xcat, (0, 2, 1))                        # [N, 5, C]
    xcat = jnp.concatenate([xcat, s2], axis=1)                   # [N, 11, C]
    return xcat.reshape(N, -1)


def _reference_forward(x, edge_index, edge_attr=None):
    N, C = x.shape
    W = WAVELET_CONSTRUCTOR
    M = build_propagation_matrix(edge_index, edge_attr, N)

    def wavelets(x_flat):
        lvl = x_flat.astype(jnp.float32)
        levels = [lvl]
        for _ in range(16):
            lvl = 0.5 * (lvl + M @ lvl)
            levels.append(lvl)
        D = jnp.stack(levels)                                    # [17, N, F]
        return jnp.abs(jnp.einsum('kt,tnf->knf', W, D))          # [4, N, F]

    s0 = x[:, :, None]
    out1 = wavelets(x)                                           # [4, N, C]
    s1 = jnp.transpose(out1, (1, 2, 0))                          # [N, C, 4]
    out2 = wavelets(s1.reshape(N, C * 4))                        # [4, N, C*4]
    return _assemble_ref(x, s0, out1, out2, C)


# -----------------------------------------------------------------------------
if __name__ == "__main__":
    key = jax.random.PRNGKey(0)
    N, C = 128, 4                                                # nodes, in_channels
    x = jax.random.normal(key, (N, C), dtype=jnp.float32)

    # Deterministic bidirectional ring graph, edge_attr=None (unit weights).
    src = jnp.arange(N, dtype=jnp.int32)
    dst = (src + 1) % N
    edge_index = jnp.stack([jnp.concatenate([src, dst]),
                            jnp.concatenate([dst, src])])        # [2, 2N]

    out = jax.block_until_ready(legs_filter_forward(x, edge_index))
    assert out.shape == (N, 11 * C), out.shape

    ref = jax.block_until_ready(_reference_forward(x, edge_index))
    err = float(np.max(np.abs(np.asarray(out) - np.asarray(ref))))
    assert err < 1e-4, err

    print("KERNEL_OK")
</pallas_src>

<mosaic_0001>
module attributes {stable_mosaic.version = 11 : i64} {
  func.func @_legs_fused_kernel(%arg0: memref<4x128x128xf32, #tpu.memory_space<vmem>>, %arg1: memref<4x128xf32, #tpu.memory_space<vmem>>, %arg2: memref<16x128xf32, #tpu.memory_space<vmem>>, %arg3: memref<64x128xf32, #tpu.memory_space<vmem>>) attributes {dimension_semantics = [], scalar_prefetch = 0 : i64, scratch_operands = 0 : i64, tpu.core_type = #tpu.core_type<tc>} {
    %c0 = arith.constant 0 : index
    %c0_0 = arith.constant 0 : index
    %0 = vector.load %arg1[%c0, %c0_0] : memref<4x128xf32, #tpu.memory_space<vmem>>, vector<4x128xf32>
    %c0_1 = arith.constant 0 : index
    %c0_2 = arith.constant 0 : index
    %c0_3 = arith.constant 0 : index
    %1 = vector.load %arg0[%c0_1, %c0_2, %c0_3] : memref<4x128x128xf32, #tpu.memory_space<vmem>>, vector<1x128x128xf32>
    %2 = vector.shape_cast %1 : vector<1x128x128xf32> to vector<128x128xf32>
    %cst = arith.constant dense<0.000000e+00> : vector<4x128xf32>
    %3 = tpu.matmul %0, %2, %cst {dimension_numbers = #tpu.dot_dimension_numbers<[1], [0], [0], [1], [0, 0, 1, 1], [], []>} : vector<4x128xf32>, vector<128x128xf32>, vector<4x128xf32> -> vector<4x128xf32>
    %c0_4 = arith.constant 0 : index
    %c0_5 = arith.constant 0 : index
    %c0_6 = arith.constant 0 : index
    %4 = vector.load %arg0[%c0_4, %c0_5, %c0_6] : memref<4x128x128xf32, #tpu.memory_space<vmem>>, vector<1x128x128xf32>
    %5 = vector.shape_cast %4 : vector<1x128x128xf32> to vector<128x128xf32>
    %cst_7 = arith.constant dense<0.000000e+00> : vector<4x128xf32>
    %6 = tpu.matmul %3, %5, %cst_7 {dimension_numbers = #tpu.dot_dimension_numbers<[1], [0], [0], [1], [0, 0, 1, 1], [], []>} : vector<4x128xf32>, vector<128x128xf32>, vector<4x128xf32> -> vector<4x128xf32>
    %7 = arith.subf %6, %3 : vector<4x128xf32>
    %8 = math.absf %7 : vector<4x128xf32>
    %c1 = arith.constant 1 : index
    %c0_8 = arith.constant 0 : index
    %c0_9 = arith.constant 0 : index
    %9 = vector.load %arg0[%c1, %c0_8, %c0_9] : memref<4x128x128xf32, #tpu.memory_space<vmem>>, vector<1x128x128xf32>
    %10 = vector.shape_cast %9 : vector<1x128x128xf32> to vector<128x128xf32>
    %cst_10 = arith.constant dense<0.000000e+00> : vector<4x128xf32>
    %11 = tpu.matmul %6, %10, %cst_10 {dimension_numbers = #tpu.dot_dimension_numbers<[1], [0], [0], [1], [0, 0, 1, 1], [], []>} : vector<4x128xf32>, vector<128x128xf32>, vector<4x128xf32> -> vector<4x128xf32>
    %12 = arith.subf %11, %6 : vector<4x128xf32>
    %13 = math.absf %12 : vector<4x128xf32>
    %c2 = arith.constant 2 : index
    %c0_11 = arith.constant 0 : index
    %c0_12 = arith.constant 0 : index
    %14 = vector.load %arg0[%c2, %c0_11, %c0_12] : memref<4x128x128xf32, #tpu.memory_space<vmem>>, vector<1x128x128xf32>
    %15 = vector.shape_cast %14 : vector<1x128x128xf32> to vector<128x128xf32>
    %cst_13 = arith.constant dense<0.000000e+00> : vector<4x128xf32>
    %16 = tpu.matmul %11, %15, %cst_13 {dimension_numbers = #tpu.dot_dimension_numbers<[1], [0], [0], [1], [0, 0, 1, 1], [], []>} : vector<4x128xf32>, vector<128x128xf32>, vector<4x128xf32> -> vector<4x128xf32>
    %17 = arith.subf %16, %11 : vector<4x128xf32>
    %18 = math.absf %17 : vector<4x128xf32>
    %c3 = arith.constant 3 : index
    %c0_14 = arith.constant 0 : index
    %c0_15 = arith.constant 0 : index
    %19 = vector.load %arg0[%c3, %c0_14, %c0_15] : memref<4x128x128xf32, #tpu.memory_space<vmem>>, vector<1x128x128xf32>
    %20 = vector.shape_cast %19 : vector<1x128x128xf32> to vector<128x128xf32>
    %cst_16 = arith.constant dense<0.000000e+00> : vector<4x128xf32>
    %21 = tpu.matmul %16, %20, %cst_16 {dimension_numbers = #tpu.dot_dimension_numbers<[1], [0], [0], [1], [0, 0, 1, 1], [], []>} : vector<4x128xf32>, vector<128x128xf32>, vector<4x128xf32> -> vector<4x128xf32>
    %22 = arith.subf %21, %16 : vector<4x128xf32>
    %23 = math.absf %22 : vector<4x128xf32>
    %24 = tpu.concatenate %8, %13, %18, %23 in 0 : vector<4x128xf32>, vector<4x128xf32>, vector<4x128xf32>, vector<4x128xf32> -> vector<16x128xf32>
    %c0_17 = arith.constant 0 : index
    %c0_18 = arith.constant 0 : index
    %25 = vector.load %arg2[%c0_17, %c0_18] : memref<16x128xf32, #tpu.memory_space<vmem>>, vector<16x128xf32>
    tpu.vector_store %arg2[%c0_17, %c0_18], %24 {strides = array<i32>} : memref<16x128xf32, #tpu.memory_space<vmem>>, vector<16x128xf32>,
    %c0_19 = arith.constant 0 : index
    %c0_20 = arith.constant 0 : index
    %c0_21 = arith.constant 0 : index
    %26 = vector.load %arg0[%c0_19, %c0_20, %c0_21] : memref<4x128x128xf32, #tpu.memory_space<vmem>>, vector<1x128x128xf32>
    %27 = vector.shape_cast %26 : vector<1x128x128xf32> to vector<128x128xf32>
    %cst_22 = arith.constant dense<0.000000e+00> : vector<16x128xf32>
    %28 = tpu.matmul %24, %27, %cst_22 {dimension_numbers = #tpu.dot_dimension_numbers<[1], [0], [0], [1], [0, 0, 1, 1], [], []>} : vector<16x128xf32>, vector<128x128xf32>, vector<16x128xf32> -> vector<16x128xf32>
    %c0_23 = arith.constant 0 : index
    %c0_24 = arith.constant 0 : index
    %c0_25 = arith.constant 0 : index
    %29 = vector.load %arg0[%c0_23, %c0_24, %c0_25] : memref<4x128x128xf32, #tpu.memory_space<vmem>>, vector<1x128x128xf32>
    %30 = vector.shape_cast %29 : vector<1x128x128xf32> to vector<128x128xf32>
    %cst_26 = arith.constant dense<0.000000e+00> : vector<16x128xf32>
    %31 = tpu.matmul %28, %30, %cst_26 {dimension_numbers = #tpu.dot_dimension_numbers<[1], [0], [0], [1], [0, 0, 1, 1], [], []>} : vector<16x128xf32>, vector<128x128xf32>, vector<16x128xf32> -> vector<16x128xf32>
    %32 = arith.subf %31, %28 : vector<16x128xf32>
    %33 = math.absf %32 : vector<16x128xf32>
    %c1_27 = arith.constant 1 : index
    %c0_28 = arith.constant 0 : index
    %c0_29 = arith.constant 0 : index
    %34 = vector.load %arg0[%c1_27, %c0_28, %c0_29] : memref<4x128x128xf32, #tpu.memory_space<vmem>>, vector<1x128x128xf32>
    %35 = vector.shape_cast %34 : vector<1x128x128xf32> to vector<128x128xf32>
    %cst_30 = arith.constant dense<0.000000e+00> : vector<16x128xf32>
    %36 = tpu.matmul %31, %35, %cst_30 {dimension_numbers = #tpu.dot_dimension_numbers<[1], [0], [0], [1], [0, 0, 1, 1], [], []>} : vector<16x128xf32>, vector<128x128xf32>, vector<16x128xf32> -> vector<16x128xf32>
    %37 = arith.subf %36, %31 : vector<16x128xf32>
    %38 = math.absf %37 : vector<16x128xf32>
    %c2_31 = arith.constant 2 : index
    %c0_32 = arith.constant 0 : index
    %c0_33 = arith.constant 0 : index
    %39 = vector.load %arg0[%c2_31, %c0_32, %c0_33] : memref<4x128x128xf32, #tpu.memory_space<vmem>>, vector<1x128x128xf32>
    %40 = vector.shape_cast %39 : vector<1x128x128xf32> to vector<128x128xf32>
    %cst_34 = arith.constant dense<0.000000e+00> : vector<16x128xf32>
    %41 = tpu.matmul %36, %40, %cst_34 {dimension_numbers = #tpu.dot_dimension_numbers<[1], [0], [0], [1], [0, 0, 1, 1], [], []>} : vector<16x128xf32>, vector<128x128xf32>, vector<16x128xf32> -> vector<16x128xf32>
    %42 = arith.subf %41, %36 : vector<16x128xf32>
    %43 = math.absf %42 : vector<16x128xf32>
    %c3_35 = arith.constant 3 : index
    %c0_36 = arith.constant 0 : index
    %c0_37 = arith.constant 0 : index
    %44 = vector.load %arg0[%c3_35, %c0_36, %c0_37] : memref<4x128x128xf32, #tpu.memory_space<vmem>>, vector<1x128x128xf32>
    %45 = vector.shape_cast %44 : vector<1x128x128xf32> to vector<128x128xf32>
    %cst_38 = arith.constant dense<0.000000e+00> : vector<16x128xf32>
    %46 = tpu.matmul %41, %45, %cst_38 {dimension_numbers = #tpu.dot_dimension_numbers<[1], [0], [0], [1], [0, 0, 1, 1], [], []>} : vector<16x128xf32>, vector<128x128xf32>, vector<16x128xf32> -> vector<16x128xf32>
    %47 = arith.subf %46, %41 : vector<16x128xf32>
    %48 = math.absf %47 : vector<16x128xf32>
    %49 = tpu.concatenate %33, %38, %43, %48 in 0 : vector<16x128xf32>, vector<16x128xf32>, vector<16x128xf32>, vector<16x128xf32> -> vector<64x128xf32>
    %c0_39 = arith.constant 0 : index
    %c0_40 = arith.constant 0 : index
    %50 = vector.load %arg3[%c0_39, %c0_40] : memref<64x128xf32, #tpu.memory_space<vmem>>, vector<64x128xf32>
    tpu.vector_store %arg3[%c0_39, %c0_40], %49 {strides = array<i32>} : memref<64x128xf32, #tpu.memory_space<vmem>>, vector<64x128xf32>,
    return
  }
}

</mosaic_0001>

<bundles_post_ra>
// kernel: legs_filter_forward.1
= control target key start
LH: loop header
LB: loop body
LE: loop exit
PB: predicated region body
PF: predicated region fallthrough
CT: control target
= control target key end

     0   :  { %vm195_vm0 = vcmask 1043456   ;;  %s1050_s0 = inlined_call_operand.vmem [shape: f32[4,128,128], index: 0, kind: input, shape index: {}]   ;;  %s1051_s1 = inlined_call_operand.vmem [shape: f32[4,128], index: 1, kind: input, shape index: {}]   ;;  %s1052_s2 = inlined_call_operand.vmem [shape: f32[16,128], index: 2, kind: output, shape index: {0}]   ;;  %s1053_s3 = inlined_call_operand.vmem [shape: f32[64,128], index: 3, kind: output, shape index: {1}]  }
   0x1   :  { %v562_v0 = vld [vmem:[%s1050_s0 + $0x78] sm:$0xff]  ;;  %v567_v1 = vld [vmem:[%s1050_s0 + $0x70] sm:$0xff]  ;;  %v574_v2 = vld [vmem:[%s1050_s0 + $0x68] sm:$0xff] }
   0x2   :  { %30 = vmatpush.msra.mxu0 %v562_v0  ;;  %50 = vmatpush.msra.mxu1 %v562_v0  ;;  %v581_v3 = vld [vmem:[%s1050_s0 + $0x60] sm:$0xff]  ;;  %v588_v4 = vld [vmem:[%s1050_s0 + $0x58] sm:$0xff]  ;;  %v595_v5 = vld [vmem:[%s1050_s0 + $0x50] sm:$0xff] }
   0x3   :  { %v602_v6 = vld [vmem:[%s1050_s0 + $0x48] sm:$0xff]  ;;  %v609_v7 = vld [vmem:[%s1050_s0 + $0x40] sm:$0xff]  ;;  %v616_v8 = vld [vmem:[%s1050_s0 + $0x38] sm:$0xff] }
   0x4   :  { %31 = vmatpush.msra.mxu0 %v567_v1  ;;  %51 = vmatpush.msra.mxu1 %v567_v1  ;;  %v623_v9 = vld [vmem:[%s1050_s0 + $0x30] sm:$0xff]  ;;  %v630_v10 = vld [vmem:[%s1050_s0 + $0x28] sm:$0xff]  ;;  %v637_v11 = vld [vmem:[%s1050_s0 + $0x20] sm:$0xff] }
   0x5   :  { %v644_v12 = vld [vmem:[%s1050_s0 + $0x18] sm:$0xff]  ;;  %v651_v13 = vld [vmem:[%s1050_s0 + $0x10] sm:$0xff]  ;;  %v658_v14 = vld [vmem:[%s1050_s0 + $0x8] sm:$0xff] }
   0x6   :  { %32 = vmatpush.msra.mxu0 %v574_v2  ;;  %52 = vmatpush.msra.mxu1 %v574_v2  ;;  %v665_v15 = vld [vmem:[%s1050_s0] sm:$0xff]  ;;  %v693_v17 = vld [vmem:[%s1050_s0 + $0xf8] sm:$0xff]  ;;  %v698_v18 = vld [vmem:[%s1050_s0 + $0xf0] sm:$0xff] }
   0x7   :  { %v13_v16 = vld [vmem:[%s1051_s1] sm:$0xf]  ;;  %89 = vmatpush.msra.mxu2 %v693_v17  ;;  %v704_v19 = vld [vmem:[%s1050_s0 + $0xe8] sm:$0xff]  ;;  %v716_v21 = vld [vmem:[%s1050_s0 + $0xd8] sm:$0xff] }
   0x8   :  { %33 = vmatpush.msra.mxu0 %v581_v3  ;;  %53 = vmatpush.msra.mxu1 %v581_v3  ;;  %v710_v20 = vld [vmem:[%s1050_s0 + $0xe0] sm:$0xff]  ;;  %v722_v22 = vld [vmem:[%s1050_s0 + $0xd0] sm:$0xff]  ;;  %v728_v23 = vld [vmem:[%s1050_s0 + $0xc8] sm:$0xff] }
   0x9   :  { %90 = vmatpush.msra.mxu2 %v698_v18  ;;  %v734_v24 = vld [vmem:[%s1050_s0 + $0xc0] sm:$0xff]  ;;  %v740_v25 = vld [vmem:[%s1050_s0 + $0xb8] sm:$0xff]  ;;  %v746_v26 = vld [vmem:[%s1050_s0 + $0xb0] sm:$0xff] }
   0xa   :  { %34 = vmatpush.msra.mxu0 %v588_v4  ;;  %54 = vmatpush.msra.mxu1 %v588_v4  ;;  %v752_v27 = vld [vmem:[%s1050_s0 + $0xa8] sm:$0xff]  ;;  %v758_v28 = vld [vmem:[%s1050_s0 + $0xa0] sm:$0xff]  ;;  %v764_v29 = vld [vmem:[%s1050_s0 + $0x98] sm:$0xff] }
   0xb   :  { %91 = vmatpush.msra.mxu2 %v704_v19  ;;  %v770_v30 = vld [vmem:[%s1050_s0 + $0x90] sm:$0xff]  ;;  %v776_v31 = vld [vmem:[%s1050_s0 + $0x88] sm:$0xff]  ;;  %v786_v33 = vld [vmem:[%s1050_s0 + $0x80] sm:$0xff] }
   0xc   :  { %35 = vmatpush.msra.mxu0 %v595_v5  ;;  %55 = vmatpush.msra.mxu1 %v595_v5  ;;  %v793_v34 = vld [vmem:[%s1050_s0 + $0x178] sm:$0xff]  ;;  %v798_v35 = vld [vmem:[%s1050_s0 + $0x170] sm:$0xff]  ;;  %v805_v36 = vld [vmem:[%s1050_s0 + $0x168] sm:$0xff] }
   0xd   :  { %92 = vmatpush.msra.mxu2 %v710_v20  ;;  %128 = vmatpush.msra.mxu3 %v793_v34  ;;  %v812_v37 = vld [vmem:[%s1050_s0 + $0x160] sm:$0xff]  ;;  %v819_v38 = vld [vmem:[%s1050_s0 + $0x158] sm:$0xff]  ;;  %v826_v39 = vld [vmem:[%s1050_s0 + $0x150] sm:$0xff] }
   0xe   :  { %36 = vmatpush.msra.mxu0 %v602_v6  ;;  %56 = vmatpush.msra.mxu1 %v602_v6  ;;  %v833_v40 = vld [vmem:[%s1050_s0 + $0x148] sm:$0xff]  ;;  %v840_v41 = vld [vmem:[%s1050_s0 + $0x140] sm:$0xff]  ;;  %v847_v42 = vld [vmem:[%s1050_s0 + $0x138] sm:$0xff] }
   0xf   :  { %93 = vmatpush.msra.mxu2 %v716_v21  ;;  %129 = vmatpush.msra.mxu3 %v798_v35  ;;  %v854_v43 = vld [vmem:[%s1050_s0 + $0x130] sm:$0xff]  ;;  %v861_v44 = vld [vmem:[%s1050_s0 + $0x128] sm:$0xff]  ;;  %v868_v45 = vld [vmem:[%s1050_s0 + $0x120] sm:$0xff] }
  0x10   :  { %37 = vmatpush.msra.mxu0 %v609_v7  ;;  %57 = vmatpush.msra.mxu1 %v609_v7  ;;  %v875_v46 = vld [vmem:[%s1050_s0 + $0x118] sm:$0xff]  ;;  %v882_v47 = vld [vmem:[%s1050_s0 + $0x110] sm:$0xff]  ;;  %v889_v48 = vld [vmem:[%s1050_s0 + $0x108] sm:$0xff] }
  0x11   :  { %94 = vmatpush.msra.mxu2 %v722_v22  ;;  %130 = vmatpush.msra.mxu3 %v805_v36  ;;  %v916_v50 = vld [vmem:[%s1050_s0 + $0x100] sm:$0xff]  ;;  %v458_v51 = vld [vmem:[%s1050_s0 + $0x1f8] sm:$0xff]  ;;  %v457_v52 = vld [vmem:[%s1050_s0 + $0x1f0] sm:$0xff] }
  0x12   :  { %38 = vmatpush.msra.mxu0 %v616_v8  ;;  %58 = vmatpush.msra.mxu1 %v616_v8  ;;  %v934_v53 = vld [vmem:[%s1050_s0 + $0x1e8] sm:$0xff]  ;;  %v940_v54 = vld [vmem:[%s1050_s0 + $0x1e0] sm:$0xff]  ;;  %v454_v55 = vld [vmem:[%s1050_s0 + $0x1d8] sm:$0xff] }
  0x13   :  { %95 = vmatpush.msra.mxu2 %v728_v23  ;;  %131 = vmatpush.msra.mxu3 %v812_v37  ;;  %v453_v56 = vld [vmem:[%s1050_s0 + $0x1d0] sm:$0xff]  ;;  %v452_v57 = vld [vmem:[%s1050_s0 + $0x1c8] sm:$0xff]  ;;  %v451_v58 = vld [vmem:[%s1050_s0 + $0x1c0] sm:$0xff] }
  0x14   :  { %39 = vmatpush.msra.mxu0 %v623_v9  ;;  %59 = vmatpush.msra.mxu1 %v623_v9  ;;  %v450_v59 = vld [vmem:[%s1050_s0 + $0x1b8] sm:$0xff]  ;;  %v449_v60 = vld [vmem:[%s1050_s0 + $0x1b0] sm:$0xff]  ;;  %v448_v61 = vld [vmem:[%s1050_s0 + $0x1a8] sm:$0xff] }
  0x15   :  { %96 = vmatpush.msra.mxu2 %v734_v24  ;;  %132 = vmatpush.msra.mxu3 %v819_v38  ;;  %v447_v62 = vld [vmem:[%s1050_s0 + $0x1a0] sm:$0xff]  ;;  %v446_v63 = vld [vmem:[%s1050_s0 + $0x198] sm:$0xff] }
  0x16   :  { %40 = vmatpush.msra.mxu0 %v630_v10  ;;  %60 = vmatpush.msra.mxu1 %v630_v10 }
  0x17   :  { %97 = vmatpush.msra.mxu2 %v740_v25  ;;  %133 = vmatpush.msra.mxu3 %v826_v39 }
  0x18   :  { %41 = vmatpush.msra.mxu0 %v637_v11  ;;  %61 = vmatpush.msra.mxu1 %v637_v11 }
  0x19   :  { %98 = vmatpush.msra.mxu2 %v746_v26  ;;  %134 = vmatpush.msra.mxu3 %v833_v40 }
  0x1a   :  { %42 = vmatpush.msra.mxu0 %v644_v12  ;;  %62 = vmatpush.msra.mxu1 %v644_v12 }
  0x1b   :  { %99 = vmatpush.msra.mxu2 %v752_v27  ;;  %135 = vmatpush.msra.mxu3 %v840_v41 }
  0x1c   :  { %43 = vmatpush.msra.mxu0 %v651_v13  ;;  %63 = vmatpush.msra.mxu1 %v651_v13 }
  0x1d   :  { %100 = vmatpush.msra.mxu2 %v758_v28  ;;  %136 = vmatpush.msra.mxu3 %v847_v42 }
  0x1e   :  { %44 = vmatpush.msra.mxu0 %v658_v14  ;;  %64 = vmatpush.msra.mxu1 %v658_v14 }
  0x1f   :  { %101 = vmatpush.msra.mxu2 %v764_v29  ;;  %137 = vmatpush.msra.mxu3 %v854_v43 }
  0x20   :  { %45 = vmatpush.msra.mxu0 %v665_v15  ;;  %65 = vmatpush.msra.mxu1 %v665_v15 }
  0x21   :  { %46 = vmatmul.f32.vlgmr.msra.gmra.mxu0 %v13_v16  ;;  %102 = vmatpush.msra.mxu2 %v770_v30 }
  0x22   :  { %216 = vmatpush.msrb.mxu1 %v562_v0  ;;  %138 = vmatpush.msra.mxu3 %v861_v44 }
  0x23   :  { %103 = vmatpush.msra.mxu2 %v776_v31  ;;  %167 = vmatpush.msrb.mxu0 %v458_v51 }
  0x24   :  { %217 = vmatpush.msrb.mxu1 %v567_v1  ;;  %139 = vmatpush.msra.mxu3 %v868_v45 }
  0x25   :  { %104 = vmatpush.msra.mxu2 %v786_v33  ;;  %168 = vmatpush.msrb.mxu0 %v457_v52 }
  0x26   :  { %218 = vmatpush.msrb.mxu1 %v574_v2  ;;  %140 = vmatpush.msra.mxu3 %v875_v46 }
  0x27   :  { %239 = vmatpush.msrb.mxu2 %v562_v0  ;;  %169 = vmatpush.msrb.mxu0 %v934_v53 }
  0x28   :  { %219 = vmatpush.msrb.mxu1 %v581_v3  ;;  %141 = vmatpush.msra.mxu3 %v882_v47 }
  0x29   :  { %240 = vmatpush.msrb.mxu2 %v567_v1  ;;  %170 = vmatpush.msrb.mxu0 %v940_v54  ;;  %v445_v1 = vld [vmem:[%s1050_s0 + $0x190] sm:$0xff] }
  0x2a   :  { %220 = vmatpush.msrb.mxu1 %v588_v4  ;;  %142 = vmatpush.msra.mxu3 %v889_v48 }
  0x2b   :  { %241 = vmatpush.msrb.mxu2 %v574_v2  ;;  %171 = vmatpush.msrb.mxu0 %v454_v55 }
  0x2c   :  { %221 = vmatpush.msrb.mxu1 %v595_v5  ;;  %143 = vmatpush.msra.mxu3 %v916_v50 }
  0x2d   :  { %242 = vmatpush.msrb.mxu2 %v581_v3  ;;  %172 = vmatpush.msrb.mxu0 %v453_v56 }
  0x2e   :  { %222 = vmatpush.msrb.mxu1 %v602_v6  ;;  %282 = vmatpush.msrb.mxu3 %v693_v17 }
  0x2f   :  { %243 = vmatpush.msrb.mxu2 %v588_v4  ;;  %173 = vmatpush.msrb.mxu0 %v452_v57  ;;  %v444_v4 = vld [vmem:[%s1050_s0 + $0x188] sm:$0xff] }
  0x30   :  { %223 = vmatpush.msrb.mxu1 %v609_v7  ;;  %283 = vmatpush.msrb.mxu3 %v698_v18 }
  0x31   :  { %244 = vmatpush.msrb.mxu2 %v595_v5  ;;  %174 = vmatpush.msrb.mxu0 %v451_v58 }
  0x32   :  { %224 = vmatpush.msrb.mxu1 %v616_v8  ;;  %284 = vmatpush.msrb.mxu3 %v704_v19 }
  0x33   :  { %245 = vmatpush.msrb.mxu2 %v602_v6  ;;  %175 = vmatpush.msrb.mxu0 %v450_v59 }
  0x34   :  { %225 = vmatpush.msrb.mxu1 %v623_v9  ;;  %285 = vmatpush.msrb.mxu3 %v710_v20 }
  0x35   :  { %246 = vmatpush.msrb.mxu2 %v609_v7  ;;  %176 = vmatpush.msrb.mxu0 %v449_v60 }
  0x36   :  { %226 = vmatpush.msrb.mxu1 %v630_v10  ;;  %286 = vmatpush.msrb.mxu3 %v716_v21 }
  0x37   :  { %247 = vmatpush.msrb.mxu2 %v616_v8  ;;  %177 = vmatpush.msrb.mxu0 %v448_v61 }
  0x38   :  { %227 = vmatpush.msrb.mxu1 %v637_v11  ;;  %287 = vmatpush.msrb.mxu3 %v722_v22 }
  0x39   :  { %248 = vmatpush.msrb.mxu2 %v623_v9  ;;  %178 = vmatpush.msrb.mxu0 %v447_v62  ;;  %v443_v9 = vld [vmem:[%s1050_s0 + $0x180] sm:$0xff] }
  0x3a   :  { %228 = vmatpush.msrb.mxu1 %v644_v12  ;;  %288 = vmatpush.msrb.mxu3 %v728_v23 }
  0x3b   :  { %249 = vmatpush.msrb.mxu2 %v630_v10  ;;  %179 = vmatpush.msrb.mxu0 %v446_v63 }
  0x3c   :  { %229 = vmatpush.msrb.mxu1 %v651_v13  ;;  %289 = vmatpush.msrb.mxu3 %v734_v24 }
  0x3d   :  { %250 = vmatpush.msrb.mxu2 %v637_v11  ;;  %180 = vmatpush.msrb.mxu0 %v445_v1 }
  0x3e   :  { %230 = vmatpush.msrb.mxu1 %v658_v14  ;;  %290 = vmatpush.msrb.mxu3 %v740_v25 }
  0x3f   :  { %251 = vmatpush.msrb.mxu2 %v644_v12  ;;  %181 = vmatpush.msrb.mxu0 %v444_v4 }
  0x40   :  { %231 = vmatpush.msrb.mxu1 %v665_v15  ;;  %291 = vmatpush.msrb.mxu3 %v746_v26 }
  0x41   :  { %252 = vmatpush.msrb.mxu2 %v651_v13  ;;  %182 = vmatpush.msrb.mxu0 %v443_v9 }
  0x42   :  { %292 = vmatpush.msrb.mxu3 %v752_v27 }
  0x43   :  { %253 = vmatpush.msrb.mxu2 %v658_v14  ;;  %325 = vmatpush.msra.mxu0 %v793_v34 }
  0x44   :  { %293 = vmatpush.msrb.mxu3 %v758_v28 }
  0x45   :  { %254 = vmatpush.msrb.mxu2 %v665_v15  ;;  %326 = vmatpush.msra.mxu0 %v798_v35 }
  0x46   :  { %294 = vmatpush.msrb.mxu3 %v764_v29 }
  0x47   :  { %327 = vmatpush.msra.mxu0 %v805_v36 }
  0x48   :  { %295 = vmatpush.msrb.mxu3 %v770_v30 }
  0x49   :  { %328 = vmatpush.msra.mxu0 %v812_v37 }
  0x4a   :  { %296 = vmatpush.msrb.mxu3 %v776_v31 }
  0x4b   :  { %329 = vmatpush.msra.mxu0 %v819_v38 }
  0x4c   :  { %297 = vmatpush.msrb.mxu3 %v786_v33 }
  0x4d   :  { %330 = vmatpush.msra.mxu0 %v826_v39 }
  0x4f   :  { %331 = vmatpush.msra.mxu0 %v833_v40 }
  0x51   :  { %332 = vmatpush.msra.mxu0 %v840_v41 }
  0x53   :  { %333 = vmatpush.msra.mxu0 %v847_v42 }
  0x55   :  { %334 = vmatpush.msra.mxu0 %v854_v43 }
  0x57   :  { %335 = vmatpush.msra.mxu0 %v861_v44 }
  0x59   :  { %336 = vmatpush.msra.mxu0 %v868_v45 }
  0x5b   :  { %337 = vmatpush.msra.mxu0 %v875_v46 }
  0x5d   :  { %338 = vmatpush.msra.mxu0 %v882_v47 }
  0x5f   :  { %339 = vmatpush.msra.mxu0 %v889_v48 }
  0x61   :  { %340 = vmatpush.msra.mxu0 %v916_v50 }
  0x9e   :  { %v780_v32 = vpop.f32.mrf.mxu0 }
  0x9f   :  { %66 = vmatmul.f32.vlgmr.msra.gmra.mxu1 %v780_v32 }
  0xa0   :  { %368 = vmatpush.msra.mxu1 %v458_v51 }
  0xa2   :  { %369 = vmatpush.msra.mxu1 %v457_v52 }
  0xa4   :  { %370 = vmatpush.msra.mxu1 %v934_v53 }
  0xa6   :  { %371 = vmatpush.msra.mxu1 %v940_v54 }
  0xa8   :  { %372 = vmatpush.msra.mxu1 %v454_v55 }
  0xaa   :  { %373 = vmatpush.msra.mxu1 %v453_v56 }
  0xac   :  { %374 = vmatpush.msra.mxu1 %v452_v57 }
  0xae   :  { %375 = vmatpush.msra.mxu1 %v451_v58 }
  0xb0   :  { %376 = vmatpush.msra.mxu1 %v450_v59 }
  0xb2   :  { %377 = vmatpush.msra.mxu1 %v449_v60 }
  0xb4   :  { %378 = vmatpush.msra.mxu1 %v448_v61 }
  0xb6   :  { %379 = vmatpush.msra.mxu1 %v447_v62 }
  0xb8   :  { %380 = vmatpush.msra.mxu1 %v446_v63 }
  0xba   :  { %381 = vmatpush.msra.mxu1 %v445_v1 }
  0xbc   :  { %382 = vmatpush.msra.mxu1 %v444_v4 }
  0xbe   :  { %383 = vmatpush.msra.mxu1 %v443_v9 }
 0x11c   :  { %v894_v49 = vpop.f32.mrf.mxu1 }
 0x11d   :  { %105 = vmatmul.f32.vlgmr.msra.gmra.mxu2 %v894_v49  ;;  %v70_v2 = vsub.f32 %v894_v49, %v780_v32 }
 0x11e   :  { %507 = vmatpush.msra.mxu2 %v793_v34 }
 0x11f   :  { %v71_v6 = vand.u32 2147483647, %v70_v2 }
 0x120   :  { %508 = vmatpush.msra.mxu2 %v798_v35 }
 0x122   :  { %509 = vmatpush.msra.mxu2 %v805_v36 }
 0x124   :  { %510 = vmatpush.msra.mxu2 %v812_v37 }
 0x126   :  { %511 = vmatpush.msra.mxu2 %v819_v38 }
 0x128   :  { %512 = vmatpush.msra.mxu2 %v826_v39 }
 0x12a   :  { %513 = vmatpush.msra.mxu2 %v833_v40 }
 0x12c   :  { %514 = vmatpush.msra.mxu2 %v840_v41 }
 0x12e   :  { %515 = vmatpush.msra.mxu2 %v847_v42 }
 0x130   :  { %516 = vmatpush.msra.mxu2 %v854_v43 }
 0x132   :  { %517 = vmatpush.msra.mxu2 %v861_v44 }
 0x134   :  { %518 = vmatpush.msra.mxu2 %v868_v45 }
 0x136   :  { %519 = vmatpush.msra.mxu2 %v875_v46 }
 0x138   :  { %520 = vmatpush.msra.mxu2 %v882_v47 }
 0x13a   :  { %521 = vmatpush.msra.mxu2 %v889_v48 }
 0x13c   :  { %522 = vmatpush.msra.mxu2 %v916_v50 }
 0x1a0   :  { %v983_v0 = vpop.f32.mrf.mxu2 }
 0x1a1   :  { %v109_v3 = vsub.f32 %v983_v0, %v894_v49  ;;  %144 = vmatmul.f32.vlgmr.msra.gmra.mxu3 %v983_v0 }
 0x1a2   :  { %523 = vmatpush.msra.mxu3 %v458_v51 }
 0x1a3   :  { %v110_v5 = vand.u32 2147483647, %v109_v3 }
 0x1a4   :  { %524 = vmatpush.msra.mxu3 %v457_v52 }
 0x1a5   :  { %v190_v7 = vrot.slane %v110_v5, 4 }
 0x1a6   :  { %525 = vmatpush.msra.mxu3 %v934_v53 }
 0x1a7   :  { %v196_v8 = vsel %vm195_vm0, %v71_v6, %v190_v7 }
 0x1a8   :  { %232 = vmatmul.f32.vlgmr.msrb.gmra.mxu1 %v196_v8  ;;  %198 = vst [vmem:[%s1052_s2] sm:$0xff] %v196_v8  ;;  %526 = vmatpush.msra.mxu3 %v940_v54 }
 0x1aa   :  { %527 = vmatpush.msra.mxu3 %v454_v55 }
 0x1ac   :  { %528 = vmatpush.msra.mxu3 %v453_v56 }
 0x1ae   :  { %529 = vmatpush.msra.mxu3 %v452_v57 }
 0x1b0   :  { %530 = vmatpush.msra.mxu3 %v451_v58 }
 0x1b2   :  { %531 = vmatpush.msra.mxu3 %v450_v59 }
 0x1b4   :  { %532 = vmatpush.msra.mxu3 %v449_v60 }
 0x1b6   :  { %533 = vmatpush.msra.mxu3 %v448_v61 }
 0x1b8   :  { %534 = vmatpush.msra.mxu3 %v447_v62 }
 0x1ba   :  { %535 = vmatpush.msra.mxu3 %v446_v63 }
 0x1bc   :  { %536 = vmatpush.msra.mxu3 %v445_v1 }
 0x1be   :  { %537 = vmatpush.msra.mxu3 %v444_v4 }
 0x1c0   :  { %538 = vmatpush.msra.mxu3 %v443_v9 }
 0x224   :  { %v145_v10 = vpop.f32.mrf.mxu3 }
 0x225   :  { %183 = vmatmul.f32.vlgmr.msrb.gmra.mxu0 %v145_v10  ;;  %v233_v11 = vpop.f32.mrf.mxu1  ;;  %v148_v13 = vsub.f32 %v145_v10, %v983_v0 }
 0x226   :  { %255 = vmatmul.f32.vlgmr.msrb.gmra.mxu2 %v233_v11 }
 0x227   :  { %v149_v16 = vand.u32 2147483647, %v148_v13 }
 0x2a2   :  { %v184_v12 = vpop.f32.mrf.mxu0 }
 0x2a3   :  { %v187_v14 = vsub.f32 %v184_v12, %v145_v10 }
 0x2a5   :  { %v188_v15 = vand.u32 2147483647, %v187_v14 }
 0x2a7   :  { %v193_v17 = vrot.slane %v188_v15, 4 }
 0x2a9   :  { %v256_v18 = vpop.f32.mrf.mxu2  ;;  %v197_v19 = vsel %vm195_vm0, %v149_v16, %v193_v17 }
 0x2aa   :  { %v262_v20 = vsub.f32 %v256_v18, %v233_v11  ;;  %199 = vst [vmem:[%s1052_s2 + $0x8] sm:$0xff] %v197_v19  ;;  %235 = vmatmul.f32.gmra.mxu1 %v197_v19  ;;  %298 = vmatmul.f32.vlgmr.msrb.gmra.mxu3 %v256_v18 }
 0x2ac   :  { %v264_v21 = vand.u32 2147483647, %v262_v20 }
 0x2ae   :  { %395 = vst [vmem:[%s1053_s3] sm:$0xff] %v264_v21 }
 0x327   :  { %v236_v22 = vpop.f32.mrf.mxu1 }
 0x328   :  { %258 = vmatmul.f32.gmra.mxu2 %v236_v22 }
 0x32d   :  { %v299_v23 = vpop.f32.mrf.mxu3 }
 0x32e   :  { %v305_v24 = vsub.f32 %v299_v23, %v256_v18  ;;  %341 = vmatmul.f32.vlgmr.msra.gmra.mxu0 %v299_v23 }
 0x330   :  { %v307_v25 = vand.u32 2147483647, %v305_v24 }
 0x332   :  { %397 = vst [vmem:[%s1053_s3 + $0x10] sm:$0xff] %v307_v25 }
 0x3ab   :  { %v259_v26 = vpop.f32.mrf.mxu2  ;;  %v342_v27 = vpop.f32.mrf.mxu0 }
 0x3ac   :  { %v263_v28 = vsub.f32 %v259_v26, %v236_v22  ;;  %v348_v29 = vsub.f32 %v342_v27, %v299_v23  ;;  %301 = vmatmul.f32.gmra.mxu3 %v259_v26  ;;  %384 = vmatmul.f32.vlgmr.msra.gmra.mxu1 %v342_v27 }
 0x3ae   :  { %v265_v30 = vand.u32 2147483647, %v263_v28  ;;  %v350_v31 = vand.u32 2147483647, %v348_v29 }
 0x3b0   :  { %396 = vst [vmem:[%s1053_s3 + $0x8] sm:$0xff] %v265_v30 }
 0x3b1   :  { %399 = vst [vmem:[%s1053_s3 + $0x20] sm:$0xff] %v350_v31 }
 0x429   :  { %v385_v32 = vpop.f32.mrf.mxu1 }
 0x42a   :  { %v391_v33 = vsub.f32 %v385_v32, %v342_v27 }
 0x42c   :  { %v393_v34 = vand.u32 2147483647, %v391_v33 }
 0x42e   :  { %401 = vst [vmem:[%s1053_s3 + $0x30] sm:$0xff] %v393_v34 }
 0x42f   :  { %v302_v35 = vpop.f32.mrf.mxu3 }
 0x430   :  { %v306_v36 = vsub.f32 %v302_v35, %v259_v26  ;;  %344 = vmatmul.f32.vlgmr.msra.gmra.mxu2 %v302_v35 }
 0x432   :  { %v308_v37 = vand.u32 2147483647, %v306_v36 }
 0x434   :  { %398 = vst [vmem:[%s1053_s3 + $0x18] sm:$0xff] %v308_v37 }
 0x4b3   :  { %v345_v38 = vpop.f32.mrf.mxu2 }
 0x4b4   :  { %v349_v39 = vsub.f32 %v345_v38, %v302_v35  ;;  %387 = vmatmul.f32.vlgmr.msra.gmra.mxu3 %v345_v38 }
 0x4b6   :  { %v351_v40 = vand.u32 2147483647, %v349_v39 }
 0x4b8   :  { %400 = vst [vmem:[%s1053_s3 + $0x28] sm:$0xff] %v351_v40 }
 0x537   :  { %v388_v41 = vpop.f32.mrf.mxu3 }
 0x538   :  { %v392_v42 = vsub.f32 %v388_v41, %v345_v38 }
 0x53a   :  { %v394_v43 = vand.u32 2147483647, %v392_v42 }
 0x53c   :  { %402 = vst [vmem:[%s1053_s3 + $0x38] sm:$0xff] %v394_v43 }

</bundles_post_ra>
